<compile_context>
chip_gen: v7x
topology: tpu7x:2x2x1
jax: 0.10.0
libtpu: 0.0.40
codegen_flags: <defaults>
</compile_context>

<pallas_src>
import jax
import jax.numpy as jnp
from jax.experimental import pallas as pl
from jax.experimental.pallas import tpu as pltpu

_LANE = 128
# Minimum sublane tile per dtype itemsize (f32 -> 8, bf16 -> 16, int8/fp8 -> 32).
_MIN_SUBLANE = {4: 8, 2: 16, 1: 32}
# Below this many bytes, launch one un-gridded block (pipeline setup not worth it).
_SMALL_BYTES = 128 * 1024


def _make_apply_kernel(function):
    """Pallas kernel body that applies `function` elementwise to one block."""

    def kernel(x_ref, o_ref):
        o_ref[...] = function(x_ref[...]).astype(o_ref.dtype)

    return kernel


def _device_kind():
    try:
        return jax.devices()[0].device_kind.lower()
    except Exception:  # pragma: no cover - defensive, e.g. no devices yet
        return ""


def _block_bytes_and_vmem_cap():
    """(target block bytes, vmem_limit cap) per TPU generation.

    v7x: ~3.2 TB/s HBM -> 2 MiB blocks leave ~25% pipeline overhead, so use
    8 MiB blocks (4x resident = 32 MiB, under 44 MiB limit / 64 MiB physical).
    v6e: 128 MiB VMEM, plenty of headroom -> 8 MiB blocks, 64 MiB limit.
    v5e / unknown: 2-4 MiB blocks already sit at ~94% of the ~820 GB/s roofline.
    """
    kind = _device_kind()
    if "v7" in kind:
        return 8 << 20, 44 << 20
    if "v6" in kind:
        return 8 << 20, 64 << 20
    return 4 << 20, 32 << 20


def _cost_estimate(function, rows, dtype, n, itemsize):
    """Advisory CostEstimate, with transcendentals counted via estimate_cost."""
    flops, transcendentals = n, 0
    try:
        ce = pl.estimate_cost(function, jax.ShapeDtypeStruct((rows, _LANE), dtype))
        flops = max(int(getattr(ce, "flops", n)), 1)
        transcendentals = int(getattr(ce, "transcendentals", 0))
    except Exception:
        pass
    return pl.CostEstimate(flops=flops, transcendentals=transcendentals,
                           bytes_accessed=2 * n * itemsize)


def pallas_apply(function, x, *, in_place=False):
    """Pallas equivalent of Apply(function)(x) for an elementwise `function`.

    Lane-aligned inputs (x.size % 128 == 0) are reshaped (a bitcast, no copy)
    to a (rows, 128) slab and processed by a Pallas kernel: a single un-gridded
    block below 128 KiB, otherwise generation-sized tiles on a >=2-step
    "parallel" grid.  Ragged or shape/dtype-changing cases fall back to a
    direct (XLA-fusible) call, which is strictly cheaper than padding around a
    custom call.  Dtype is preserved end-to-end.
    """
    orig_shape = x.shape
    n = x.size
    if n == 0:
        return function(x)

    # Elementwise guard: the slab trick only makes sense for same-shape,
    # same-dtype maps.  Anything else runs through the direct path.
    # TODO(synk): functions with axis semantics that happen to preserve shape
    # (e.g. softmax) are not detectable here; callers should pass use_pallas=False.
    try:
        out_aval = jax.eval_shape(function, jax.ShapeDtypeStruct(x.shape, x.dtype))
    except Exception:
        return function(x)
    if out_aval.shape != tuple(orig_shape) or out_aval.dtype != x.dtype:
        return function(x)

    if n < _LANE or n % _LANE != 0:
        # Ragged sizes: any pad/slice/concat around the custom call would copy
        # the whole tensor (~3x HBM traffic for a mem-bound op).  A fused XLA
        # pointwise op is strictly better here, so bypass Pallas.
        return function(x)

    dtype = x.dtype
    itemsize = jnp.dtype(dtype).itemsize
    min_sublane = _MIN_SUBLANE.get(itemsize, 8)
    rows = n // _LANE
    slab = x.reshape(rows, _LANE)          # contiguous reshape: no data movement
    kernel = _make_apply_kernel(function)
    total_bytes = n * itemsize
    # Aliasing only saves the extra output allocation; opt-in because the
    # caller must be willing to donate the (lane-aligned) input buffer.
    aliases = {0: 0} if in_place else {}

    if total_bytes <= _SMALL_BYTES or rows <= 2 * min_sublane:
        # Small-input fast path: whole array is one VMEM block, no grid.
        out = pl.pallas_call(
            kernel,
            out_shape=jax.ShapeDtypeStruct((rows, _LANE), dtype),
            input_output_aliases=aliases,
        )(slab)
    else:
        target_block_bytes, vmem_cap = _block_bytes_and_vmem_cap()
        row_bytes = _LANE * itemsize
        target_rows = max(min_sublane, target_block_bytes // row_bytes)
        # Guarantee >= 2 grid steps so both TensorCores on v7x get work.
        block_rows = min(target_rows, pl.cdiv(rows, 2))
        block_rows = max(min_sublane, (block_rows // min_sublane) * min_sublane)
        grid = (pl.cdiv(rows, block_rows),)        # masked partial tail block
        block_bytes = block_rows * row_bytes
        # ~4x block resident (double-buffered in + out) plus slack, capped per
        # generation so it is always legal (v7x: 64 MiB physical per TC).
        vmem_limit = int(min(vmem_cap, max(16 << 20, 6 * block_bytes)))

        out = pl.pallas_call(
            kernel,
            out_shape=jax.ShapeDtypeStruct((rows, _LANE), dtype),
            grid_spec=pltpu.PrefetchScalarGridSpec(
                num_scalar_prefetch=0,
                grid=grid,
                in_specs=[pl.BlockSpec((block_rows, _LANE), lambda i: (i, 0))],
                out_specs=pl.BlockSpec((block_rows, _LANE), lambda i: (i, 0)),
            ),
            compiler_params=pltpu.CompilerParams(
                dimension_semantics=("parallel",),  # shards across v7x's 2 TCs
                vmem_limit_bytes=vmem_limit,
            ),
            cost_estimate=_cost_estimate(function, rows, dtype, n, itemsize),
            input_output_aliases=aliases,
        )(slab)

    return out.reshape(orig_shape)


class Apply:
    """JAX/Pallas mirror of the PyTorch `Apply` module (no parameters).

    Set use_pallas=False when the wrapped function is a trivially fusible
    pointwise op inside a larger jit region: XLA fusion into the producer /
    consumer avoids the dedicated HBM round-trip a custom call forces.
    """

    def __init__(self, function, use_pallas=True):
        self.function = function
        self.use_pallas = use_pallas

    def __call__(self, *args, **kwargs):
        # Single-tensor call -> run the wrapped function inside a Pallas kernel.
        # isinstance(..., jax.Array) is True for concrete arrays AND tracers, so
        # the Pallas path is taken under jit/vmap as well.
        if (self.use_pallas and len(args) == 1 and not kwargs
                and isinstance(args[0], jax.Array)):
            return pallas_apply(self.function, args[0])
        # Multi-arg / kwarg / non-array usage: same semantics as PyTorch forward.
        return self.function(*args, **kwargs)


if __name__ == "__main__":
    key = jax.random.PRNGKey(0)

    # --- Test 1: primary example (small path, n % 128 == 0), ReLU -----------
    x = jax.random.normal(key, (2, 4, 16, 16), dtype=jnp.float32)
    relu = Apply(lambda t: jnp.maximum(t, 0.0))
    y = jax.block_until_ready(relu(x))
    ref = jnp.maximum(x, 0.0)
    assert y.shape == x.shape and y.dtype == x.dtype
    assert jnp.allclose(y, ref), "test1 mismatch"

    # --- Test 2: same module under jit (tracer dispatch must hit Pallas) ----
    y_jit = jax.block_until_ready(jax.jit(relu)(x))
    assert jnp.allclose(y_jit, ref), "test2 (jit) mismatch"

    # --- Test 3: ragged size (n % 128 != 0) -> direct fusible path, tanh ----
    k1, k2, k3 = jax.random.split(key, 3)
    x2 = jax.random.normal(k1, (3, 5, 37, 41), dtype=jnp.float32)
    tanh_mod = Apply(jnp.tanh)
    y2 = jax.block_until_ready(tanh_mod(x2))
    assert jnp.allclose(y2, jnp.tanh(x2), atol=1e-6), "test3 mismatch"

    # --- Test 4: tiled path with >=2-step parallel grid, leaky ReLU ---------
    x3 = jax.random.normal(k2, (3, 8, 160, 160), dtype=jnp.float32)  # ~2.4 MiB
    leaky = Apply(lambda t: jnp.where(t > 0, t, 0.1 * t))
    y3 = jax.block_until_ready(leaky(x3))
    assert jnp.allclose(y3, jnp.where(x3 > 0, x3, 0.1 * x3)), "test4 mismatch"

    # --- Test 5: bf16 (dtype-aware sublane tile), tiled path -----------------
    x4 = jax.random.normal(k3, (4, 8, 160, 160), dtype=jnp.bfloat16)  # ~1.6 MiB
    y4 = jax.block_until_ready(relu(x4))
    assert y4.dtype == jnp.bfloat16
    assert jnp.allclose(y4.astype(jnp.float32),
                        jnp.maximum(x4, 0).astype(jnp.float32)), "test5 mismatch"

    print("KERNEL_OK")
</pallas_src>

<mosaic_0001>
module attributes {stable_mosaic.version = 11 : i64} {
  func.func @kernel(%arg0: memref<16x128xf32, #tpu.memory_space<vmem>>, %arg1: memref<16x128xf32, #tpu.memory_space<vmem>>) attributes {dimension_semantics = [], scalar_prefetch = 0 : i64, scratch_operands = 0 : i64, tpu.core_type = #tpu.core_type<tc>} {
    %c0 = arith.constant 0 : index
    %c0_0 = arith.constant 0 : index
    %0 = vector.load %arg0[%c0, %c0_0] : memref<16x128xf32, #tpu.memory_space<vmem>>, vector<16x128xf32>
    %cst = arith.constant 0.000000e+00 : f32
    %1 = vector.broadcast %cst : f32 to vector<16x128xf32>
    %2 = arith.maximumf %0, %1 : vector<16x128xf32>
    %c0_1 = arith.constant 0 : index
    %c0_2 = arith.constant 0 : index
    %3 = vector.load %arg1[%c0_1, %c0_2] : memref<16x128xf32, #tpu.memory_space<vmem>>, vector<16x128xf32>
    tpu.vector_store %arg1[%c0_1, %c0_2], %2 {strides = array<i32>} : memref<16x128xf32, #tpu.memory_space<vmem>>, vector<16x128xf32>,
    return
  }
}

</mosaic_0001>

<bundles_post_ra>
// kernel: tpu_custom_call.1
= control target key start
LH: loop header
LB: loop body
LE: loop exit
PB: predicated region body
PF: predicated region fallthrough
CT: control target
= control target key end

     0   :  { %6 = vsyncpa [#allocation3], 0  ;;  %s136_s0 = inlined_call_operand.hbm [shape: f32[16,128], index: 0, kind: input, shape index: {}]   ;;  %s137_s1 = inlined_call_operand.hbm [shape: f32[16,128], index: 1, kind: output, shape index: {}]  }
   0x1   :  { %7 = vsyncpa [#allocation4], 0  ;;  %s98_s6 = smov [#allocation2]   ;;  %s50_s10 = scalar_lea.hbm %s136_s0, 256 }
   0x2   :  { %s13_s7 = sshll.u32 %s98_s6, 4  ;;  %p51_p0 = scmp.ne.s32.totalorder %s136_s0, %s50_s10  ;;  %s14_s7 = int_to_ptr.vmem [resolvable:$true] %s13_s7 }
   0x3   :  { %p54_p1 = scmp.lt.u32.totalorder %s50_s10, %s136_s0 }
   0x5   :  { %p56_p2 = pnand %p54_p1, %p51_p0 }
   0x7   :  { %59 = shalt.err (!%p56_p2)
}
   0x8   :  { %s60_s15 = scalar_lea.vmem %s14_s7, 256  ;;  %p65_p4 = scmp.lt.s32.totalorder %s14_s7, %s14_s7 }
   0x9   :  { %p61_p3 = scmp.ne.s32.totalorder %s14_s7, %s60_s15  ;;  %p66_p5 = scmp.lt.s32.totalorder %s60_s15, %s60_s15 }
   0xb   :  { %p67_p6 = por %p66_p5, %p65_p4 }
   0xd   :  { %p68_p7 = pnand %p67_p6, %p61_p3 }
   0xf   :  { %71 = shalt.err (!%p68_p7)
}
  0x10   :  { %s99_s16 = smov 128   ;;  %s100_s17 = smov 8  }
  0x11   :  { %19 = dma.hbm_to_vmem [thread:$0]  %s136_s0, 256, %s14_s7, [#allocation3], %s99_s16, %s99_s16, %s100_s17  }
  0x12   :  { %94 = dma.done.wait [#allocation3], 256  }
  0x13   :  { %95 = vsyncadd [#allocation3], 4294967040  ;;  %s101_s20 = smov [#allocation5]   ;;  %v23_v0 = vld [vmem:[#allocation2] sm:$0xff]  ;;  %v24_v1 = vld [vmem:[#allocation2 + $0x8] sm:$0xff] }
  0x14   :  { %s34_s21 = sshll.u32 %s101_s20, 4  ;;  %v25_v2 = vmax.f32 %v23_v0, 0.0  ;;  %v26_v3 = vmax.f32 %v24_v1, 0.0  ;;  %s35_s21 = int_to_ptr.vmem [resolvable:$true] %s34_s21 }
  0x15   :  { %s72_s22 = scalar_lea.vmem %s35_s21, 256  ;;  %p77_p9 = scmp.lt.s32.totalorder %s35_s21, %s35_s21 }
  0x16   :  { %27 = vst [vmem:[#allocation5] sm:$0xff] %v25_v2  ;;  %28 = vst [vmem:[#allocation5 + $0x8] sm:$0xff] %v26_v3  ;;  %p73_p8 = scmp.ne.s32.totalorder %s35_s21, %s72_s22  ;;  %p78_p10 = scmp.lt.s32.totalorder %s72_s22, %s72_s22 }
  0x18   :  { %p79_p11 = por %p78_p10, %p77_p9 }
  0x1a   :  { %p80_p12 = pnand %p79_p11, %p73_p8 }
  0x1c   :  { %83 = shalt.err (!%p80_p12)
}
  0x1d   :  { %s84_s24 = scalar_lea.hbm %s137_s1, 256 }
  0x1e   :  { %p85_p13 = scmp.ne.s32.totalorder %s137_s1, %s84_s24  ;;  %p88_p0 = scmp.lt.u32.totalorder %s84_s24, %s137_s1 }
  0x20   :  { %p90_p1 = pnand %p88_p0, %p85_p13 }
  0x22   :  { %93 = shalt.err (!%p90_p1)
}
  0x23   :  { %40 = dma.vmem_to_hbm [thread:$0]  %s35_s21, 256, %s137_s1, [#allocation4], %s99_s16, %s99_s16, %s100_s17  }
  0x24   :  { %96 = dma.done.wait [#allocation4], 256  }
  0x25   :  { %97 = vsyncadd [#allocation4], 4294967040 }
  0x26   :  { %44 = vsyncpa [#allocation3], 1 }
  0x27   :  { %45 = vsyncpa [#allocation4], 1 }

</bundles_post_ra>
